<compile_context>
chip_gen: v6e
topology: v6e:2x2x1
jax: 0.10.0
libtpu: 0.0.40
codegen_flags: <defaults>
</compile_context>

<pallas_src>
import functools
import math
from typing import NamedTuple, Union

import jax
import jax.numpy as jnp
from jax.experimental import pallas as pl
from jax.experimental.pallas import tpu as pltpu


def _round_up(x: int, m: int) -> int:
    return ((x + m - 1) // m) * m


# VMEM tile-selection budget (conservative for v7x's 64 MiB physical VMEM)
# and the explicit scoped-VMEM limit handed to the compiler.
_VMEM_TILE_BUDGET = 40 * 1024 * 1024
_VMEM_LIMIT_BYTES = 48 * 1024 * 1024
_TM_MAX = 512  # worst-case tm assumed when sizing tk during weight prep


def _pick_tile(d: int, candidates=(512, 256, 128)) -> int:
    """Largest candidate tile that minimizes padding of dimension `d`."""
    best, best_pad = candidates[0], _round_up(d, candidates[0])
    for c in candidates[1:]:
        p = _round_up(d, c)
        if p < best_pad:
            best, best_pad = c, p
    return best


def _select_tk(K: int, tn: int, itemsize: int) -> int:
    """Keep K resident when the double-buffered blocks fit VMEM; else tile."""
    k_full = _round_up(K, 128)

    def vmem_bytes(tk, need_acc):
        b = 2 * itemsize * (_TM_MAX * tk + tk * tn)  # double-buffered x + W
        b += 2 * itemsize * _TM_MAX * tn             # double-buffered output
        if need_acc:
            b += 4 * _TM_MAX * tn                    # f32 accumulator scratch
        return b

    if vmem_bytes(k_full, need_acc=False) <= _VMEM_TILE_BUDGET:
        return k_full
    for tk in (2048, 1024, 512):
        if vmem_bytes(tk, need_acc=True) <= _VMEM_TILE_BUDGET:
            return tk
    return 256


class PreparedWeight(NamedTuple):
    wt: jax.Array   # (Kp, Np) pre-transposed, zero-padded weight (MXU-ready)
    dim_in: int     # original K (used for the 1/sqrt(dim_in) scale)
    dim_out: int    # original N
    tn: int
    tk: int


def prepare_weight(weight: jax.Array, *, tn: int | None = None,
                   tk: int | None = None) -> PreparedWeight:
    """One-time prep: transpose to (K, N) and pad to tile multiples.

    Call once per layer (outside the jitted forward) so no per-call HBM
    transpose/copy of the weight is paid.
    """
    N, K = weight.shape
    if tn is None:
        tn = 128 if N <= 128 else _pick_tile(N)
    if tk is None:
        tk = _select_tk(K, tn, jnp.dtype(weight.dtype).itemsize)
    Np = _round_up(N, tn)
    Kp = _round_up(K, tk)
    wt = weight.T  # (K, N): lane-dense N, MXU-ready
    if (Kp, Np) != (K, N):
        wt = jnp.pad(wt, ((0, Kp - K), (0, Np - N)))
    return PreparedWeight(wt=wt, dim_in=K, dim_out=N, tn=tn, tk=tk)


# ----------------------------- kernels ------------------------------------


def _linear_kres_kernel(x_ref, w_ref, o_ref, *, scale: float):
    # K fully resident: single MXU pass, no scratch accumulator, no pl.when.
    o_ref[...] = (
        jnp.dot(x_ref[...], w_ref[...], preferred_element_type=jnp.float32)
        * scale
    ).astype(o_ref.dtype)


def _linear_acc_kernel(x_ref, w_ref, o_ref, acc_ref, *, scale: float):
    k = pl.program_id(2)

    @pl.when(k == 0)
    def _():
        acc_ref[...] = jnp.zeros_like(acc_ref)

    acc_ref[...] += jnp.dot(
        x_ref[...], w_ref[...], preferred_element_type=jnp.float32
    )

    @pl.when(k == pl.num_programs(2) - 1)
    def _():
        o_ref[...] = (acc_ref[...] * scale).astype(o_ref.dtype)


# ----------------------------- wrapper -------------------------------------


def linear_pallas(x: jax.Array,
                  weight: Union[jax.Array, PreparedWeight],
                  *, scale_before: bool = False,
                  tm: int | None = None) -> jax.Array:
    """x: (B, S, dim_in); weight: PreparedWeight or (dim_out, dim_in) array."""
    if not isinstance(weight, PreparedWeight):
        weight = prepare_weight(weight)  # fallback; prefer prepping once

    B, S, K = x.shape
    assert K == weight.dim_in
    M = B * S
    N = weight.dim_out
    Kp, Np = weight.wt.shape
    tn, tk = weight.tn, weight.tk

    # scale_before only reorders an associative scale in the PyTorch module;
    # with f32 accumulation both orders give the same result, so the kernel
    # applies the scale once on the f32 accumulator.
    del scale_before
    scale = 1.0 / math.sqrt(K)  # original dim_in, not padded K

    # Adaptive tm minimizes M padding (e.g. M=300 -> tm=128, Mp=384).
    if tm is None:
        tm = _round_up(M, 16) if M < 128 else _pick_tile(M)
    Mp = _round_up(M, tm)

    # v7x megacore: ensure the parallel (M, N) grid has >= 2 blocks so both
    # TensorCores are used for small-M (decode) shapes.
    if (Mp // tm) * (Np // tn) == 1 and tn > 128:
        tn //= 2  # Np stays a multiple of tn (both multiples of 128)

    grid_m, grid_n, grid_k = Mp // tm, Np // tn, Kp // tk

    x2 = x.reshape(M, K)
    if (Mp, Kp) != (M, K):
        # K must be explicitly zero-padded (OOB-K would corrupt results);
        # M padding is minimized by the adaptive tm above.
        x2 = jnp.pad(x2, ((0, Mp - M), (0, Kp - K)))

    elt = jnp.dtype(x.dtype).itemsize
    cost = pl.CostEstimate(
        flops=2 * Mp * Np * Kp,
        transcendentals=0,
        # Actual streaming traffic: x re-read per N-block, W per M-block.
        bytes_accessed=(Mp * Kp * grid_n + Kp * Np * grid_m + Mp * Np) * elt,
    )
    sems = ("parallel", "parallel") + (("arbitrary",) if grid_k > 1 else ())
    cparams = pltpu.CompilerParams(
        dimension_semantics=sems,
        vmem_limit_bytes=_VMEM_LIMIT_BYTES,
    )

    if grid_k == 1:
        # K-resident: 2-D grid, no scratch accumulator.
        out = pl.pallas_call(
            functools.partial(_linear_kres_kernel, scale=scale),
            out_shape=jax.ShapeDtypeStruct((Mp, Np), x.dtype),
            grid_spec=pltpu.PrefetchScalarGridSpec(
                num_scalar_prefetch=0,
                grid=(grid_m, grid_n),
                in_specs=[
                    pl.BlockSpec((tm, Kp), lambda i, j: (i, 0)),
                    pl.BlockSpec((Kp, tn), lambda i, j: (0, j)),
                ],
                out_specs=pl.BlockSpec((tm, tn), lambda i, j: (i, j)),
            ),
            compiler_params=cparams,
            cost_estimate=cost,
        )(x2, weight.wt)
    else:
        # K tiled: 3-D grid with f32 VMEM accumulator.
        out = pl.pallas_call(
            functools.partial(_linear_acc_kernel, scale=scale),
            out_shape=jax.ShapeDtypeStruct((Mp, Np), x.dtype),
            grid_spec=pltpu.PrefetchScalarGridSpec(
                num_scalar_prefetch=0,
                grid=(grid_m, grid_n, grid_k),
                in_specs=[
                    pl.BlockSpec((tm, tk), lambda i, j, k: (i, k)),
                    pl.BlockSpec((tk, tn), lambda i, j, k: (k, j)),
                ],
                out_specs=pl.BlockSpec((tm, tn), lambda i, j, k: (i, j)),
                scratch_shapes=[pltpu.VMEM((tm, tn), jnp.float32)],
            ),
            compiler_params=cparams,
            cost_estimate=cost,
        )(x2, weight.wt)

    if (Mp, Np) != (M, N):
        out = out[:M, :N]
    return out.reshape(B, S, N)


def make_linear_params(dim_in, dim_out, init_mean=0.0, init_std=1.0,
                       dtype=jnp.bfloat16, key=None):
    """Deterministic synthetic init matching the module's parameter shape."""
    if key is None:
        key = jax.random.PRNGKey(0)
    w = jax.random.normal(key, (dim_out, dim_in), dtype=jnp.float32)
    w = w * init_std + init_mean
    return w.astype(dtype)


def _ref_linear(x, w, dim_in):
    return (jnp.dot(x.astype(jnp.float32), w.astype(jnp.float32).T)
            / math.sqrt(dim_in)).astype(x.dtype)


if __name__ == "__main__":
    key = jax.random.PRNGKey(0)
    kx, kw, kx2, kw2, kx3, kw3 = jax.random.split(key, 6)

    # --- 1) module-sized small case: batch=2, seq=8, dim_in=32, dim_out=64 --
    batch, seq_len, dim_in, dim_out = 2, 8, 32, 64
    x = jax.random.normal(kx, (batch, seq_len, dim_in),
                          dtype=jnp.float32).astype(jnp.bfloat16)
    weight = make_linear_params(dim_in, dim_out, key=kw)
    w_prep = prepare_weight(weight)  # one-time prep (cached per layer)

    y = jax.block_until_ready(linear_pallas(x, w_prep, scale_before=False))
    ref = _ref_linear(x, weight, dim_in)
    assert y.shape == (batch, seq_len, dim_out)
    assert jnp.allclose(y.astype(jnp.float32), ref.astype(jnp.float32),
                        atol=2e-2, rtol=2e-2)

    # scale_before=True branch (mathematically identical result).
    y2 = jax.block_until_ready(linear_pallas(x, w_prep, scale_before=True))
    assert jnp.allclose(y2.astype(jnp.float32), ref.astype(jnp.float32),
                        atol=2e-2, rtol=2e-2)

    # --- 2) non-divisible M, 128-aligned K/N: padding + v7x grid split ------
    xb = jax.random.normal(kx2, (2, 200, 384),
                           dtype=jnp.float32).astype(jnp.bfloat16)
    wb = make_linear_params(384, 512, key=kw2)
    wb_prep = prepare_weight(wb)
    yb = jax.block_until_ready(linear_pallas(xb, wb_prep))
    refb = _ref_linear(xb, wb, 384)
    assert yb.shape == (2, 200, 512)
    assert jnp.allclose(yb.astype(jnp.float32), refb.astype(jnp.float32),
                        atol=2e-2, rtol=2e-2)

    # --- 3) force K tiling (tk override) to exercise the accumulator path ---
    xc = jax.random.normal(kx3, (2, 8, 384),
                           dtype=jnp.float32).astype(jnp.bfloat16)
    wc = make_linear_params(384, 256, key=kw3)
    wc_prep = prepare_weight(wc, tk=128)  # 3 K-steps -> acc kernel
    yc = jax.block_until_ready(linear_pallas(xc, wc_prep))
    refc = _ref_linear(xc, wc, 384)
    assert yc.shape == (2, 8, 256)
    assert jnp.allclose(yc.astype(jnp.float32), refc.astype(jnp.float32),
                        atol=2e-2, rtol=2e-2)

    print("KERNEL_OK")
</pallas_src>

<mosaic_0001>
module attributes {stable_mosaic.version = 11 : i64} {
  func.func @_linear_kres_kernel(%arg0: i32, %arg1: i32, %arg2: memref<16x128xbf16, #tpu.memory_space<vmem>>, %arg3: memref<128x128xbf16, #tpu.memory_space<vmem>>, %arg4: memref<16x128xbf16, #tpu.memory_space<vmem>>) attributes {dimension_semantics = [#tpu.dimension_semantics<parallel>, #tpu.dimension_semantics<parallel>], iteration_bounds = array<i64: 1, 1>, scalar_prefetch = 0 : i64, scratch_operands = 0 : i64, tpu.core_type = #tpu.core_type<tc>, window_params = [{transform_indices = @transform_0, window_bounds = array<i64: 16, 128>}, {transform_indices = @transform_1, window_bounds = array<i64: 128, 128>}, {transform_indices = @transform_2, window_bounds = array<i64: 16, 128>}]} {
    %c0 = arith.constant 0 : index
    %c0_0 = arith.constant 0 : index
    %0 = vector.load %arg2[%c0, %c0_0] : memref<16x128xbf16, #tpu.memory_space<vmem>>, vector<16x128xbf16>
    %c0_1 = arith.constant 0 : index
    %c0_2 = arith.constant 0 : index
    %1 = vector.load %arg3[%c0_1, %c0_2] : memref<128x128xbf16, #tpu.memory_space<vmem>>, vector<128x128xbf16>
    %cst = arith.constant dense<0.000000e+00> : vector<16x128xf32>
    %2 = tpu.matmul %0, %1, %cst {dimension_numbers = #tpu.dot_dimension_numbers<[1], [0], [0], [1], [0, 0, 1, 1], [], []>} : vector<16x128xbf16>, vector<128x128xbf16>, vector<16x128xf32> -> vector<16x128xf32>
    %cst_3 = arith.constant 0.176776692 : f32
    %3 = vector.broadcast %cst_3 : f32 to vector<16x128xf32>
    %4 = arith.mulf %2, %3 : vector<16x128xf32>
    %5 = arith.truncf %4 : vector<16x128xf32> to vector<16x128xbf16>
    %c0_4 = arith.constant 0 : index
    %c0_5 = arith.constant 0 : index
    %6 = vector.load %arg4[%c0_4, %c0_5] : memref<16x128xbf16, #tpu.memory_space<vmem>>, vector<16x128xbf16>
    tpu.vector_store %arg4[%c0_4, %c0_5], %5 {strides = array<i32>} : memref<16x128xbf16, #tpu.memory_space<vmem>>, vector<16x128xbf16>,
    return
  }
  func.func @transform_0(%arg0: i32, %arg1: i32) -> (i32, i32) {
    %c0_i32 = arith.constant 0 : i32
    %c0_i32_0 = arith.constant 0 : i32
    return %arg0, %c0_i32 : i32, i32
  }
  func.func @transform_1(%arg0: i32, %arg1: i32) -> (i32, i32) {
    %c0_i32 = arith.constant 0 : i32
    %c0_i32_0 = arith.constant 0 : i32
    return %c0_i32, %arg1 : i32, i32
  }
  func.func @transform_2(%arg0: i32, %arg1: i32) -> (i32, i32) {
    %c0_i32 = arith.constant 0 : i32
    return %arg0, %arg1 : i32, i32
  }
}

</mosaic_0001>

<bundles_post_ra>
// kernel: tpu_custom_call.1
= control target key start
LH: loop header
LB: loop body
LE: loop exit
PB: predicated region body
PF: predicated region fallthrough
CT: control target
= control target key end

     0   :  { %7 = vsyncpa [#allocation3], 0  ;;  %s353_s0 = inlined_call_operand.hbm [shape: bf16[16,128], index: 0, kind: input, shape index: {}]   ;;  %s354_s1 = inlined_call_operand.hbm [shape: bf16[128,128], index: 1, kind: input, shape index: {}]   ;;  %s355_s2 = inlined_call_operand.hbm [shape: bf16[16,128], index: 2, kind: output, shape index: {}]  }
   0x1   :  { %8 = vsyncpa [#allocation6], 0 }
   0x2   :  { %9 = vsyncpa [#allocation4], 0  ;;  %s313_s9 = smov [#allocation2]  }
   0x3   :  { %s15_s10 = sshll.u32 %s313_s9, 4  ;;  %s16_s10 = int_to_ptr.vmem [resolvable:$true] %s15_s10 }
   0x4   :  { %s255_s11 = scalar_lea.vmem %s16_s10, 128  ;;  %p260_p1 = scmp.lt.s32.totalorder %s16_s10, %s16_s10 }
   0x5   :  { %p256_p0 = scmp.ne.s32.totalorder %s16_s10, %s255_s11  ;;  %p261_p2 = scmp.lt.s32.totalorder %s255_s11, %s255_s11 }
   0x7   :  { %p262_p3 = por %p261_p2, %p260_p1 }
   0x9   :  { %p263_p4 = pnand %p262_p3, %p256_p0 }
   0xb   :  { %266 = shalt.err (!%p263_p4)
}
   0xc   :  { %s314_s12 = smov 64   ;;  %s315_s13 = smov 4  }
   0xd   :  { %21 = dma.hbm_to_vmem [thread:$0]  %s353_s0, 128, %s16_s10, [#allocation3], %s314_s12, %s314_s12, %s315_s13  }
   0xe   :  { %s316_s16 = smov [#allocation5]  }
   0xf   :  { %s27_s17 = sshll.u32 %s316_s16, 4  ;;  %s28_s17 = int_to_ptr.vmem [resolvable:$true] %s27_s17 }
  0x10   :  { %s275_s18 = scalar_lea.vmem %s28_s17, 1024  ;;  %p280_p6 = scmp.lt.s32.totalorder %s28_s17, %s28_s17 }
  0x11   :  { %p276_p5 = scmp.ne.s32.totalorder %s28_s17, %s275_s18  ;;  %p281_p7 = scmp.lt.s32.totalorder %s275_s18, %s275_s18 }
  0x13   :  { %p282_p8 = por %p281_p7, %p280_p6 }
  0x15   :  { %p283_p9 = pnand %p282_p8, %p276_p5 }
  0x17   :  { %286 = shalt.err (!%p283_p9)
}
  0x18   :  { %33 = dma.hbm_to_vmem [thread:$0]  %s354_s1, 1024, %s28_s17, [#allocation6], %s314_s12, %s314_s12, %s315_s13  }
  0x19   :  { %307 = dma.done.wait [#allocation3], 128  }
  0x1a   :  { %308 = vsyncadd [#allocation3], 4294967168 }
  0x1b   :  { %309 = dma.done.wait [#allocation6], 1024  }
  0x1c   :  { %310 = vsyncadd [#allocation6], 4294966272  ;;  %v317_v0 = vmov 0.0   ;;  %vm318_vm0 = vmmov 0   ;;  %v238_v1 = vld [vmem:[#allocation5 + $0x38] sm:$0xff]   ;;  %v239_v2 = vld [vmem:[#allocation5 + $0x30] sm:$0xff]  }
  0x1d   :  { %211 = vmatprep.subr.bf16.mxu0 %v317_v0  ;;  %227 = vmatprep.mubr.msk.bf16.mxu0 %vm318_vm0, %v317_v0  ;;  %v240_v3 = vld [vmem:[#allocation5 + $0x28] sm:$0xff]   ;;  %v241_v4 = vld [vmem:[#allocation5 + $0x20] sm:$0xff]   ;;  %v242_v5 = vld [vmem:[#allocation5 + $0x18] sm:$0xff]   ;;  %s319_s0 = smov [#allocation7]  }
  0x1e   :  { %212 = vmatpush3.bf16.msra.mxu0 %v238_v1  ;;  %v243_v6 = vld [vmem:[#allocation5 + $0x10] sm:$0xff]   ;;  %v244_v7 = vld [vmem:[#allocation5 + $0x8] sm:$0xff]   ;;  %v245_v8 = vld [vmem:[#allocation5] sm:$0xff]   ;;  %s171_s1 = sshll.u32 %s319_s0, 4  ;;  %s172_s1 = int_to_ptr.vmem [resolvable:$true] %s171_s1 }
  0x1f   :  { %213 = vmatprep.subr.bf16.mxu0 %v317_v0  ;;  %v246_v9 = vld [vmem:[#allocation2] sm:$0xff]   ;;  %s287_s21 = scalar_lea.vmem %s172_s1, 128  ;;  %p292_p11 = scmp.lt.s32.totalorder %s172_s1, %s172_s1 }
  0x20   :  { %p288_p10 = scmp.ne.s32.totalorder %s172_s1, %s287_s21  ;;  %p293_p12 = scmp.lt.s32.totalorder %s287_s21, %s287_s21 }
  0x22   :  { %214 = vmatpush3.bf16.msra.mxu0 %v239_v2  ;;  %p294_p13 = por %p293_p12, %p292_p11 }
  0x23   :  { %215 = vmatprep.subr.bf16.mxu0 %v317_v0 }
  0x24   :  { %p295_p0 = pnand %p294_p13, %p288_p10 }
  0x26   :  { %216 = vmatpush3.bf16.msra.mxu0 %v240_v3 }
  0x27   :  { %217 = vmatprep.subr.bf16.mxu0 %v317_v0 }
  0x2a   :  { %218 = vmatpush3.bf16.msra.mxu0 %v241_v4 }
  0x2b   :  { %219 = vmatprep.subr.bf16.mxu0 %v317_v0 }
  0x2e   :  { %220 = vmatpush3.bf16.msra.mxu0 %v242_v5 }
  0x2f   :  { %221 = vmatprep.subr.bf16.mxu0 %v317_v0 }
  0x32   :  { %222 = vmatpush3.bf16.msra.mxu0 %v243_v6 }
  0x33   :  { %223 = vmatprep.subr.bf16.mxu0 %v317_v0 }
  0x36   :  { %224 = vmatpush3.bf16.msra.mxu0 %v244_v7 }
  0x37   :  { %225 = vmatprep.subr.bf16.mxu0 %v317_v0 }
  0x3a   :  { %226 = vmatpush3.bf16.msra.mxu0 %v245_v8 }
  0x3d   :  { %228 = vmatmul.mubr.bf16.vlgmr.msra.gmra.mxu0 %v246_v9 }
  0xfd   :  { %v147_v10 = vpop.f32.mrf.mxu0 }
  0xfe   :  { %v154_v13 = vmul.f32 0.17677669, %v147_v10 }
  0xff   :  { %v229_v11 = vpop.f32.mrf.mxu0 }
 0x101   :  { %v150_v12 = vpop.f32.mrf.mxu0 }
 0x102   :  { %v155_v14 = vmul.f32 0.17677669, %v150_v12 }
 0x103   :  { %v230_v15 = vpop.f32.mrf.mxu0 }
 0x104   :  { %v200_v16 = vpack.c.bf16 %v155_v14, %v154_v13 }
 0x106   :  { %201 = vst [vmem:[#allocation7] sm:$0xff] %v200_v16  }
 0x107   :  { %298 = shalt.err (!%p295_p0)
}
 0x108   :  { %177 = dma.vmem_to_hbm [thread:$0]  %s172_s1, 128, %s355_s2, [#allocation4], %s314_s12, %s314_s12, %s315_s13  }
 0x109   :  { %311 = dma.done.wait [#allocation4], 128  }
 0x10a   :  { %312 = vsyncadd [#allocation4], 4294967168 }
 0x10b   :  { %181 = vsyncpa [#allocation3], 1 }
 0x10c   :  { %182 = vsyncpa [#allocation6], 1 }
 0x10d   :  { %183 = vsyncpa [#allocation4], 1 }

</bundles_post_ra>
